<compile_context>
chip_gen: v7x
topology: tpu7x:2x2x1
jax: 0.10.0
libtpu: 0.0.40
codegen_flags: <defaults>
</compile_context>

<pallas_src>
import jax
import jax.numpy as jnp
from jax import lax
from jax.experimental import pallas as pl
from jax.experimental.pallas import tpu as pltpu

IN_FEATS = 1
HIDDEN_FEATS = 32
OUT_FEATS = 16

# ---- packed weight-slab layout (rows of a (104, 128) f32 array) ------------
_ROW_WGA_AUG = 0                      # rows  0:32, cols 0:33  -> [wga | wga@a1]
_ROW_W2 = HIDDEN_FEATS                # rows 32:64, cols 0:32  -> w2
_ROW_W3 = 2 * HIDDEN_FEATS            # rows 64:96, cols 0:16  -> w3
_ROW_VECS = 3 * HIDDEN_FEATS          # rows 96:104 (one aligned (8,128) block)
#   vec row 0: w1_row (1,32)   vec row 1: b1 (1,32)   vec row 2: b2 (1,32)
#   vec row 3: b3 (1,16)       vec row 4: c2_row = (wga@a2)^T (1,32)
#   vec row 5: wfc_row (1,16)
_SLAB_ROWS = _ROW_VECS + 8            # 104
_SLAB_COLS = 128


def pack_params(params):
    """Fold + pack all parameters into one VMEM slab and one SMEM scalar."""
    w1, b1, wga, attn, w2, b2, w3, b3, wfc, bfc = params
    a1 = attn[:HIDDEN_FEATS, :]                       # (H, 1)
    a2 = attn[HIDDEN_FEATS:, :]                       # (H, 1)
    wga_aug = jnp.concatenate([wga, wga @ a1], axis=1)  # (H, H+1): h2 and f1 fused
    c2_row = (wga @ a2).T                              # (1, H): g2[j] = h[j] . (wga@a2)

    slab = jnp.zeros((_SLAB_ROWS, _SLAB_COLS), jnp.float32)
    slab = slab.at[_ROW_WGA_AUG:_ROW_WGA_AUG + HIDDEN_FEATS,
                   0:HIDDEN_FEATS + 1].set(wga_aug)
    slab = slab.at[_ROW_W2:_ROW_W2 + HIDDEN_FEATS, 0:HIDDEN_FEATS].set(w2)
    slab = slab.at[_ROW_W3:_ROW_W3 + HIDDEN_FEATS, 0:OUT_FEATS].set(w3)
    slab = slab.at[_ROW_VECS + 0, 0:HIDDEN_FEATS].set(w1[0])
    slab = slab.at[_ROW_VECS + 1, 0:HIDDEN_FEATS].set(b1)
    slab = slab.at[_ROW_VECS + 2, 0:HIDDEN_FEATS].set(b2)
    slab = slab.at[_ROW_VECS + 3, 0:OUT_FEATS].set(b3)
    slab = slab.at[_ROW_VECS + 4, 0:HIDDEN_FEATS].set(c2_row[0])
    slab = slab.at[_ROW_VECS + 5, 0:OUT_FEATS].set(wfc.T[0])
    bfc_smem = bfc.reshape(1, 1).astype(jnp.float32)
    return slab, bfc_smem


def reaction_direction_predictor(adj, feats, params):
    """adj: (B,N,N) or (N,N); feats: (B,N,1) or (N,1). Returns (B,1) or (1,)."""
    single = adj.ndim == 2
    if single:
        adj, feats = adj[None], feats[None]
    B, N, _ = adj.shape
    graph = jnp.concatenate([adj, feats], axis=2)          # (B, N, N+1)
    slab, bfc = pack_params(params)

    def kernel(graph_ref, w_ref, bfc_ref, out_ref):
        g = graph_ref[...]                                  # (N, N+1)
        a = g[:, :N]                                        # adjacency
        x = g[:, N:N + 1]                                   # node features (N,1)

        wga_aug = w_ref[_ROW_WGA_AUG:_ROW_WGA_AUG + HIDDEN_FEATS,
                        0:HIDDEN_FEATS + 1]                 # (32, 33)
        w2 = w_ref[_ROW_W2:_ROW_W2 + HIDDEN_FEATS, 0:HIDDEN_FEATS]
        w3 = w_ref[_ROW_W3:_ROW_W3 + HIDDEN_FEATS, 0:OUT_FEATS]
        vecs = w_ref[_ROW_VECS:_ROW_VECS + 8, :]            # one aligned (8,128) load
        w1_row = vecs[0:1, 0:HIDDEN_FEATS]
        b1 = vecs[1:2, 0:HIDDEN_FEATS]
        b2 = vecs[2:3, 0:HIDDEN_FEATS]
        b3 = vecs[3:4, 0:OUT_FEATS]
        c2_row = vecs[4:5, 0:HIDDEN_FEATS]
        wfc_row = vecs[5:6, 0:OUT_FEATS]

        # ---- conv1 (re-associated: adj @ (x * w1_row)); relu(leaky_relu) == relu
        xw = x * w1_row                                     # (N,1)*(1,32) VPU bcast
        h = jnp.dot(a, xw, preferred_element_type=jnp.float32) + b1
        h = jnp.maximum(h, 0.0)

        # ---- GraphAttentionLayer (fused projections) ----
        hf = jnp.dot(h, wga_aug, preferred_element_type=jnp.float32)  # (N, 33)
        h2 = hf[:, :HIDDEN_FEATS]                           # fc(features)
        f1 = hf[:, HIDDEN_FEATS:HIDDEN_FEATS + 1]           # h2 . attn[:H]   (N,1)
        g2_row = lax.dot_general(c2_row, h,
                                 dimension_numbers=(((1,), (1,)), ((), ())),
                                 preferred_element_type=jnp.float32)   # (1,N)
        e = f1 + g2_row
        e = jnp.where(e > 0, e, 0.2 * e)                    # leakyrelu(0.2)
        att = jnp.where(a > 0, e, jnp.full_like(e, -9e15))
        att_max = jnp.max(att, axis=1, keepdims=True)
        att_exp = jnp.exp(att - att_max)
        denom = jnp.sum(att_exp, axis=1, keepdims=True)
        att = att_exp * pl.reciprocal(denom, approx=True)   # softmax(dim=1), EUP rcp
        h_prime = jnp.dot(att, h2, preferred_element_type=jnp.float32)
        h = jnp.maximum(h_prime, 0.0)                       # relu(elu(x)) == relu(x)

        # ---- conv2; relu(leaky_relu) == relu ----
        agg = jnp.dot(a, h, preferred_element_type=jnp.float32)
        h = jnp.dot(agg, w2, preferred_element_type=jnp.float32) + b2
        h = jnp.maximum(h, 0.0)

        # ---- conv3 (leaky_relu kept: no relu follows) ----
        agg = jnp.dot(a, h, preferred_element_type=jnp.float32)
        h = jnp.dot(agg, w3, preferred_element_type=jnp.float32) + b3
        h = jnp.where(h > 0, h, 0.01 * h)

        # ---- mean over nodes + fc(out_feats -> 1), bias from SMEM scalar ----
        hg = jnp.mean(h, axis=0, keepdims=True)             # (1, 16)
        out = jnp.sum(hg * wfc_row, axis=1, keepdims=True) + bfc_ref[0, 0]
        out_ref[...] = out                                  # (1, 1)

    out = pl.pallas_call(
        kernel,
        out_shape=jax.ShapeDtypeStruct((B, 1, 1), jnp.float32),
        grid=(B,),
        in_specs=[
            pl.BlockSpec((None, N, N + 1), lambda b: (b, 0, 0)),
            pl.BlockSpec((_SLAB_ROWS, _SLAB_COLS), lambda b: (0, 0)),
            pl.BlockSpec((1, 1), lambda b: (0, 0),
                         memory_space=pltpu.MemorySpace.SMEM),
        ],
        out_specs=pl.BlockSpec((None, 1, 1), lambda b: (b, 0, 0)),
        compiler_params=pltpu.CompilerParams(dimension_semantics=("parallel",)),
    )(graph, slab, bfc)

    out = out.reshape(B, 1)
    return out[0] if single else out


# ------------------------- pure-JAX reference (original math) ---------------
def reference(adj, feats, params):
    w1, b1, wga, attn, w2, b2, w3, b3, wfc, bfc = params

    def hconv(a, x, w, b):
        agg = a @ x
        return jax.nn.leaky_relu(agg @ w + b, negative_slope=0.01)

    h = jax.nn.relu(hconv(adj, feats, w1, b1))
    h2 = h @ wga
    a1 = attn[:HIDDEN_FEATS, :]
    a2 = attn[HIDDEN_FEATS:, :]
    e = jax.nn.leaky_relu((h2 @ a1) + (h2 @ a2).T, negative_slope=0.2)
    att = jnp.where(adj > 0, e, -9e15)
    att = jax.nn.softmax(att, axis=1)
    h = jax.nn.relu(jax.nn.elu(att @ h2))
    h = jax.nn.relu(hconv(adj, h, w2, b2))
    h = hconv(adj, h, w3, b3)
    hg = jnp.mean(h, axis=0)                                # (out_feats,)
    return hg @ wfc + bfc                                   # (1,)


def make_params(key):
    ks = jax.random.split(key, 10)
    s = 0.1
    w1 = s * jax.random.normal(ks[0], (IN_FEATS, HIDDEN_FEATS), jnp.float32)
    b1 = s * jax.random.normal(ks[1], (HIDDEN_FEATS,), jnp.float32)
    wga = s * jax.random.normal(ks[2], (HIDDEN_FEATS, HIDDEN_FEATS), jnp.float32)
    attn = s * jax.random.normal(ks[3], (2 * HIDDEN_FEATS, 1), jnp.float32)
    w2 = s * jax.random.normal(ks[4], (HIDDEN_FEATS, HIDDEN_FEATS), jnp.float32)
    b2 = s * jax.random.normal(ks[5], (HIDDEN_FEATS,), jnp.float32)
    w3 = s * jax.random.normal(ks[6], (HIDDEN_FEATS, OUT_FEATS), jnp.float32)
    b3 = s * jax.random.normal(ks[7], (OUT_FEATS,), jnp.float32)
    wfc = s * jax.random.normal(ks[8], (OUT_FEATS, 1), jnp.float32)
    bfc = s * jax.random.normal(ks[9], (1,), jnp.float32)
    return (w1, b1, wga, attn, w2, b2, w3, b3, wfc, bfc)


if __name__ == "__main__":
    key = jax.random.PRNGKey(0)
    k_adj, k_feat, k_par = jax.random.split(key, 3)

    B = 4                                                   # batch of graphs
    N = 8                                                   # nodes per graph
    feats = jax.random.normal(k_feat, (B, N, IN_FEATS), jnp.float32)
    adj = (jax.random.uniform(k_adj, (B, N, N)) > 0.4).astype(jnp.float32)
    adj = jnp.clip(adj + jnp.eye(N, dtype=jnp.float32)[None], 0.0, 1.0)

    params = make_params(k_par)

    out = reaction_direction_predictor(adj, feats, params)   # (B, 1)
    out = jax.block_until_ready(out)

    ref = jnp.stack([reference(adj[b], feats[b], params) for b in range(B)])
    assert out.shape == (B, 1), out.shape
    # approx reciprocal in the softmax + fp re-association => slightly looser tol
    assert jnp.allclose(out, ref, rtol=2e-3, atol=2e-3), (out, ref)
    print("KERNEL_OK")
</pallas_src>

<mosaic_0001>
module attributes {stable_mosaic.version = 11 : i64} {
  func.func @kernel(%arg0: i32, %arg1: memref<1x8x9xf32, #tpu.memory_space<vmem>>, %arg2: memref<104x128xf32, #tpu.memory_space<vmem>>, %arg3: memref<1x1xf32, #tpu.memory_space<smem>>, %arg4: memref<1x1x1xf32, #tpu.memory_space<vmem>>) attributes {dimension_semantics = [#tpu.dimension_semantics<parallel>], iteration_bounds = array<i64: 4>, scalar_prefetch = 0 : i64, scratch_operands = 0 : i64, tpu.core_type = #tpu.core_type<tc>, window_params = [{transform_indices = @transform_0, window_bounds = array<i64: 1, 8, 9>}, {pipeline_mode = #tpu.pipeline_mode<synchronous>, transform_indices = @transform_1, window_bounds = array<i64: 104, 128>}, {transform_indices = @transform_2, window_bounds = array<i64: 1, 1>}, {transform_indices = @transform_3, window_bounds = array<i64: 1, 1, 1>}]} {
    %c0 = arith.constant 0 : index
    %c0_0 = arith.constant 0 : index
    %c0_1 = arith.constant 0 : index
    %0 = vector.load %arg1[%c0, %c0_0, %c0_1] : memref<1x8x9xf32, #tpu.memory_space<vmem>>, vector<1x8x9xf32>
    %1 = vector.shape_cast %0 : vector<1x8x9xf32> to vector<8x9xf32>
    %2 = vector.extract_strided_slice %1 {offsets = [0, 0], sizes = [8, 8], strides = [1, 1]} : vector<8x9xf32> to vector<8x8xf32>
    %3 = vector.extract_strided_slice %1 {offsets = [0, 8], sizes = [8, 1], strides = [1, 1]} : vector<8x9xf32> to vector<8x1xf32>
    %c0_2 = arith.constant 0 : index
    %c0_3 = arith.constant 0 : index
    %4 = vector.load %arg2[%c0_2, %c0_3] : memref<104x128xf32, #tpu.memory_space<vmem>>, vector<32x33xf32>
    %c32 = arith.constant 32 : index
    %c0_4 = arith.constant 0 : index
    %5 = vector.load %arg2[%c32, %c0_4] : memref<104x128xf32, #tpu.memory_space<vmem>>, vector<32x32xf32>
    %c64 = arith.constant 64 : index
    %c0_5 = arith.constant 0 : index
    %6 = vector.load %arg2[%c64, %c0_5] : memref<104x128xf32, #tpu.memory_space<vmem>>, vector<32x16xf32>
    %c96 = arith.constant 96 : index
    %c0_6 = arith.constant 0 : index
    %7 = vector.load %arg2[%c96, %c0_6] : memref<104x128xf32, #tpu.memory_space<vmem>>, vector<8x128xf32>
    %8 = vector.extract_strided_slice %7 {offsets = [0, 0], sizes = [1, 32], strides = [1, 1]} : vector<8x128xf32> to vector<1x32xf32>
    %9 = vector.extract_strided_slice %7 {offsets = [1, 0], sizes = [1, 32], strides = [1, 1]} : vector<8x128xf32> to vector<1x32xf32>
    %10 = vector.extract_strided_slice %7 {offsets = [2, 0], sizes = [1, 32], strides = [1, 1]} : vector<8x128xf32> to vector<1x32xf32>
    %11 = vector.extract_strided_slice %7 {offsets = [3, 0], sizes = [1, 16], strides = [1, 1]} : vector<8x128xf32> to vector<1x16xf32>
    %12 = vector.extract_strided_slice %7 {offsets = [4, 0], sizes = [1, 32], strides = [1, 1]} : vector<8x128xf32> to vector<1x32xf32>
    %13 = vector.extract_strided_slice %7 {offsets = [5, 0], sizes = [1, 16], strides = [1, 1]} : vector<8x128xf32> to vector<1x16xf32>
    %14 = vector.broadcast %3 : vector<8x1xf32> to vector<8x32xf32>
    %15 = vector.broadcast %8 : vector<1x32xf32> to vector<8x32xf32>
    %16 = arith.mulf %14, %15 : vector<8x32xf32>
    %cst = arith.constant dense<0.000000e+00> : vector<8x32xf32>
    %17 = tpu.matmul %2, %16, %cst {dimension_numbers = #tpu.dot_dimension_numbers<[1], [0], [0], [1], [0, 0, 1, 1], [], []>} : vector<8x8xf32>, vector<8x32xf32>, vector<8x32xf32> -> vector<8x32xf32>
    %18 = vector.broadcast %9 : vector<1x32xf32> to vector<8x32xf32>
    %19 = arith.addf %17, %18 : vector<8x32xf32>
    %cst_7 = arith.constant 0.000000e+00 : f32
    %20 = vector.broadcast %cst_7 : f32 to vector<8x32xf32>
    %21 = arith.maximumf %19, %20 : vector<8x32xf32>
    %cst_8 = arith.constant dense<0.000000e+00> : vector<8x33xf32>
    %22 = tpu.matmul %21, %4, %cst_8 {dimension_numbers = #tpu.dot_dimension_numbers<[1], [0], [0], [1], [0, 0, 1, 1], [], []>} : vector<8x32xf32>, vector<32x33xf32>, vector<8x33xf32> -> vector<8x33xf32>
    %23 = vector.extract_strided_slice %22 {offsets = [0, 0], sizes = [8, 32], strides = [1, 1]} : vector<8x33xf32> to vector<8x32xf32>
    %24 = vector.extract_strided_slice %22 {offsets = [0, 32], sizes = [8, 1], strides = [1, 1]} : vector<8x33xf32> to vector<8x1xf32>
    %cst_9 = arith.constant dense<0.000000e+00> : vector<1x8xf32>
    %25 = tpu.matmul %12, %21, %cst_9 {dimension_numbers = #tpu.dot_dimension_numbers<[1], [1], [0], [0], [0, 0, 1, 0], [], []>} : vector<1x32xf32>, vector<8x32xf32>, vector<1x8xf32> -> vector<1x8xf32>
    %26 = vector.broadcast %24 : vector<8x1xf32> to vector<8x8xf32>
    %27 = vector.broadcast %25 : vector<1x8xf32> to vector<8x8xf32>
    %28 = arith.addf %26, %27 : vector<8x8xf32>
    %cst_10 = arith.constant 0.000000e+00 : f32
    %29 = vector.broadcast %cst_10 : f32 to vector<8x8xf32>
    %30 = arith.cmpf ogt, %28, %29 : vector<8x8xf32>
    %cst_11 = arith.constant 2.000000e-01 : f32
    %31 = vector.broadcast %cst_11 : f32 to vector<8x8xf32>
    %32 = arith.mulf %31, %28 : vector<8x8xf32>
    %33 = arith.select %30, %28, %32 : vector<8x8xi1>, vector<8x8xf32>
    %cst_12 = arith.constant 0.000000e+00 : f32
    %34 = vector.broadcast %cst_12 : f32 to vector<8x8xf32>
    %35 = arith.cmpf ogt, %2, %34 : vector<8x8xf32>
    %cst_13 = arith.constant -9.000000e+15 : f32
    %36 = vector.broadcast %cst_13 : f32 to vector<8x8xf32>
    %37 = arith.select %35, %33, %36 : vector<8x8xi1>, vector<8x8xf32>
    %cst_14 = arith.constant dense<0xFF800000> : vector<8xf32>
    %38 = vector.multi_reduction <maximumf>, %37, %cst_14 [1] : vector<8x8xf32> to vector<8xf32>
    %39 = vector.shape_cast %38 : vector<8xf32> to vector<8x1xf32>
    %40 = vector.broadcast %39 : vector<8x1xf32> to vector<8x8xf32>
    %41 = arith.subf %37, %40 : vector<8x8xf32>
    %42 = math.exp %41 : vector<8x8xf32>
    %cst_15 = arith.constant dense<0.000000e+00> : vector<8xf32>
    %43 = vector.multi_reduction <add>, %42, %cst_15 [1] : vector<8x8xf32> to vector<8xf32>
    %44 = vector.shape_cast %43 : vector<8xf32> to vector<8x1xf32>
    %45 = tpu.reciprocal %44 {approx = true} : vector<8x1xf32> -> vector<8x1xf32>
    %46 = vector.broadcast %45 : vector<8x1xf32> to vector<8x8xf32>
    %47 = arith.mulf %42, %46 : vector<8x8xf32>
    %cst_16 = arith.constant dense<0.000000e+00> : vector<8x32xf32>
    %48 = tpu.matmul %47, %23, %cst_16 {dimension_numbers = #tpu.dot_dimension_numbers<[1], [0], [0], [1], [0, 0, 1, 1], [], []>} : vector<8x8xf32>, vector<8x32xf32>, vector<8x32xf32> -> vector<8x32xf32>
    %cst_17 = arith.constant 0.000000e+00 : f32
    %49 = vector.broadcast %cst_17 : f32 to vector<8x32xf32>
    %50 = arith.maximumf %48, %49 : vector<8x32xf32>
    %cst_18 = arith.constant dense<0.000000e+00> : vector<8x32xf32>
    %51 = tpu.matmul %2, %50, %cst_18 {dimension_numbers = #tpu.dot_dimension_numbers<[1], [0], [0], [1], [0, 0, 1, 1], [], []>} : vector<8x8xf32>, vector<8x32xf32>, vector<8x32xf32> -> vector<8x32xf32>
    %cst_19 = arith.constant dense<0.000000e+00> : vector<8x32xf32>
    %52 = tpu.matmul %51, %5, %cst_19 {dimension_numbers = #tpu.dot_dimension_numbers<[1], [0], [0], [1], [0, 0, 1, 1], [], []>} : vector<8x32xf32>, vector<32x32xf32>, vector<8x32xf32> -> vector<8x32xf32>
    %53 = vector.broadcast %10 : vector<1x32xf32> to vector<8x32xf32>
    %54 = arith.addf %52, %53 : vector<8x32xf32>
    %cst_20 = arith.constant 0.000000e+00 : f32
    %55 = vector.broadcast %cst_20 : f32 to vector<8x32xf32>
    %56 = arith.maximumf %54, %55 : vector<8x32xf32>
    %cst_21 = arith.constant dense<0.000000e+00> : vector<8x32xf32>
    %57 = tpu.matmul %2, %56, %cst_21 {dimension_numbers = #tpu.dot_dimension_numbers<[1], [0], [0], [1], [0, 0, 1, 1], [], []>} : vector<8x8xf32>, vector<8x32xf32>, vector<8x32xf32> -> vector<8x32xf32>
    %cst_22 = arith.constant dense<0.000000e+00> : vector<8x16xf32>
    %58 = tpu.matmul %57, %6, %cst_22 {dimension_numbers = #tpu.dot_dimension_numbers<[1], [0], [0], [1], [0, 0, 1, 1], [], []>} : vector<8x32xf32>, vector<32x16xf32>, vector<8x16xf32> -> vector<8x16xf32>
    %59 = vector.broadcast %11 : vector<1x16xf32> to vector<8x16xf32>
    %60 = arith.addf %58, %59 : vector<8x16xf32>
    %cst_23 = arith.constant 0.000000e+00 : f32
    %61 = vector.broadcast %cst_23 : f32 to vector<8x16xf32>
    %62 = arith.cmpf ogt, %60, %61 : vector<8x16xf32>
    %cst_24 = arith.constant 0.00999999977 : f32
    %63 = vector.broadcast %cst_24 : f32 to vector<8x16xf32>
    %64 = arith.mulf %63, %60 : vector<8x16xf32>
    %65 = arith.select %62, %60, %64 : vector<8x16xi1>, vector<8x16xf32>
    %cst_25 = arith.constant dense<0.000000e+00> : vector<16xf32>
    %66 = vector.multi_reduction <add>, %65, %cst_25 [0] : vector<8x16xf32> to vector<16xf32>
    %67 = vector.shape_cast %66 : vector<16xf32> to vector<1x16xf32>
    %cst_26 = arith.constant 8.000000e+00 : f32
    %68 = vector.broadcast %cst_26 : f32 to vector<1x16xf32>
    %69 = arith.divf %67, %68 : vector<1x16xf32>
    %70 = arith.mulf %69, %13 : vector<1x16xf32>
    %cst_27 = arith.constant dense<0.000000e+00> : vector<1xf32>
    %71 = vector.multi_reduction <add>, %70, %cst_27 [1] : vector<1x16xf32> to vector<1xf32>
    %72 = vector.shape_cast %71 : vector<1xf32> to vector<1x1xf32>
    %c0_28 = arith.constant 0 : index
    %c0_29 = arith.constant 0 : index
    %73 = memref.load %arg3[%c0_28, %c0_29] : memref<1x1xf32, #tpu.memory_space<smem>>
    %74 = vector.broadcast %73 : f32 to vector<1x1xf32>
    %75 = arith.addf %72, %74 : vector<1x1xf32>
    %c0_30 = arith.constant 0 : index
    %c0_31 = arith.constant 0 : index
    %c0_32 = arith.constant 0 : index
    %76 = vector.load %arg4[%c0_30, %c0_31, %c0_32] : memref<1x1x1xf32, #tpu.memory_space<vmem>>, vector<1x1x1xf32>
    %77 = vector.shape_cast %76 : vector<1x1x1xf32> to vector<1x1xf32>
    %78 = vector.shape_cast %75 : vector<1x1xf32> to vector<1x1x1xf32>
    tpu.vector_store %arg4[%c0_30, %c0_31, %c0_32], %78 {strides = array<i32>} : memref<1x1x1xf32, #tpu.memory_space<vmem>>, vector<1x1x1xf32>,
    return
  }
  func.func @transform_0(%arg0: i32) -> (i32, i32, i32) {
    %c0_i32 = arith.constant 0 : i32
    %c0_i32_0 = arith.constant 0 : i32
    %c0_i32_1 = arith.constant 0 : i32
    return %arg0, %c0_i32, %c0_i32_0 : i32, i32, i32
  }
  func.func @transform_1(%arg0: i32) -> (i32, i32) {
    %c0_i32 = arith.constant 0 : i32
    %c0_i32_0 = arith.constant 0 : i32
    %c0_i32_1 = arith.constant 0 : i32
    return %c0_i32, %c0_i32_0 : i32, i32
  }
  func.func @transform_2(%arg0: i32) -> (i32, i32) {
    %c0_i32 = arith.constant 0 : i32
    %c0_i32_0 = arith.constant 0 : i32
    %c0_i32_1 = arith.constant 0 : i32
    return %c0_i32, %c0_i32_0 : i32, i32
  }
  func.func @transform_3(%arg0: i32) -> (i32, i32, i32) {
    %c0_i32 = arith.constant 0 : i32
    %c0_i32_0 = arith.constant 0 : i32
    %c0_i32_1 = arith.constant 0 : i32
    return %arg0, %c0_i32, %c0_i32_0 : i32, i32, i32
  }
}

</mosaic_0001>

<bundles_post_ra>
// kernel: tpu_custom_call.1
= control target key start
LH: loop header
LB: loop body
LE: loop exit
PB: predicated region body
PF: predicated region fallthrough
CT: control target
= control target key end

     0   :  { %s1449_s0 = inlined_call_operand.hbm [shape: f32[4,8,9], index: 0, kind: input, shape index: {}]   ;;  %s1450_s1 = inlined_call_operand.hbm [shape: f32[104,128], index: 1, kind: input, shape index: {}]   ;;  %s1451_s2 = inlined_call_operand.<no memory space> [shape: f32[1,1], index: 2, kind: input, shape index: {}]   ;;  %s1452_s3 = inlined_call_operand.vmem [shape: f32[4,1,1], index: 3, kind: output, shape index: {}]  }
   0x1   :  { %8 = sst [smem:[#allocation2]] %s1451_s2 }
   0x2   :  { %9 = vsyncpa [#allocation4], 0 }
   0x3   :  { %11 = vsyncpa [#allocation4 + $0x1], 0 }
   0x4   :  { %12 = vsyncpa [#allocation6], 0  ;;  %s1251_s14 = smov 0   ;;  %s1253_s15 = smov 0  }
   0x5   :  { %s1255_s16 = smov 0   ;;  %s1257_s17 = smov 0  }
   0x6 LB: > { %s1270_s2 = sadd.s32 4294967295, %s1217_s17   ;;  %p38_p0 = scmp.ne.s32.totalorder %s1209_s15, %s1205_s14  ;;  %s1217_s17 = sphi %s1257_s17, %s1467_s17   ;;  %s1213_s16 = sphi %s1255_s16, %s1466_s16   ;;  %s1209_s15 = sphi %s1253_s15, %s1465_s15   ;;  %s1205_s14 = sphi %s1251_s14, %s1464_s14  }
   0x7   : > { %p1453_p1 = scmp.eq.s32.totalorder %s1270_s2, 0  ;;  %p938_p2 = scmp.ge.s32.totalorder %s1217_s17, 1 }
   0x8   : > { %p117_p3 = scmp.lt.s32.totalorder %s1217_s17, 5  ;;  %s1219_s20 = smov [#allocation5]  }
   0x9   : > { %p1278_p4 = por %p1453_p1, %p38_p0  ;;  %s129_s21 = sshll.u32 %s1219_s20, 4  ;;  %s130_s21 = int_to_ptr.vmem [resolvable:$true] %s129_s21 }
   0xa   : > { %p1282_p5 = pnand %p938_p2, %p117_p3  ;;  %s1295_s23 = sadd.s32 1, %s1217_s17  }
   0xb   : > { %s1456_s18 = scalar_select %p1278_p4, 1, 0 }
   0xc   : > { %s1457_s19 = scalar_select %p1282_p5, 1, 0 }
   0xd   : > { %p1064_p6 = pneg %p1282_p5  ;;  %s25_s24 = sadd.s32 1, %s1213_s16 }
   0xe   : > { %s22_s25 = ssub.s32 %s1217_s17, %s1295_s23  ;;  %s1121_s28 = scalar_lea.hbm %s1450_s1, 1664 }
   0xf   : > { %p1290_p7 = pnand %p1064_p6, %p1453_p1  ;;  %p1122_p8 = scmp.ne.s32.totalorder %s1450_s1, %s1121_s28 }
  0x10   : > { %p1128_p12 = scmp.lt.u32.totalorder %s1121_s28, %s1450_s1 }
  0x11   : > { %p1123_p9 = pneg %p1290_p7 }
  0x13   : > { %p1124_p10 = pnand %p1123_p9, %p1122_p8 }
  0x15   : > { %p1125_p11 = pneg %p1124_p10 }
  0x17   : > { %p1130_p13 = pnand %p1128_p12, %p1125_p11 }
  0x19   : > { %1133 = shalt.err (!%p1130_p13)
}
  0x1a   : > { %s1134_s6 = scalar_lea.vmem %s130_s21, 1664  ;;  %p1142_p6 = scmp.lt.s32.totalorder %s130_s21, %s130_s21 }
  0x1b   : > { %p1135_p0 = scmp.ne.s32.totalorder %s130_s21, %s1134_s6  ;;  %p1143_p1 = scmp.lt.s32.totalorder %s1134_s6, %s1134_s6 }
  0x1d   : > { %p1137_p2 = pnand %p1135_p0, %p1123_p9  ;;  %p1144_p4 = por %p1143_p1, %p1142_p6 }
  0x1f   : > { %p1138_p3 = pneg %p1137_p2 }
  0x21   : > { %p1145_p5 = pnand %p1144_p4, %p1138_p3 }
  0x23   : > { %1148 = shalt.err (!%p1145_p5)
}
  0x24   : > { %s1220_s7 = smov 128   ;;  %s1221_s8 = smov 8  }
  0x25   : > { %1067 = dma.hbm_to_vmem [thread:$0]  (!%p1290_p7), %s1450_s1, 1664, %s130_s21, [#allocation6], %s1220_s7, %s1220_s7, %s1221_s8  }
  0x26   : > { %p23_p8 = scmp.eq.s32.totalorder %s22_s25, 0  ;;  %p32_p9 = scmp.ne.s32.totalorder %s1213_s16, %s1209_s15 }
  0x27   : > { %p33_p1 = scmp.eq.s32.totalorder %s1217_s17, 0  ;;  %p1073_p4 = scmp.lt.s32.totalorder %s1217_s17, 4 }
  0x28   : > { %s1321_s11 = scalar_select %p23_p8, %s1213_s16, %s25_s24  }
  0x29   : > { %p34_p5 = por %p33_p1, %p32_p9  ;;  %s146_s12 = sand.u32 1, %s1213_s16  }
  0x2a   : > { %s941_s13 = sshll.u32 %s146_s12, 3  ;;  %s942_s14 = sshll.u32 %s1217_s17, 7 }
  0x2b   : > { %s1328_s27 = scalar_lea.hbm %s1449_s0, %s942_s14  ;;  %s150_s21 = scalar_lea.vmem [#allocation3], %s941_s13 }
  0x2c   : > { %s157_s22 = sshll.u32 %s150_s21, 4  ;;  %p1332_p7 = pnand %p1073_p4, %p34_p5  ;;  %s1330_s22 = int_to_ptr.vmem [resolvable:$true] %s157_s22 }
  0x2d   : > { %s147_s17 = scalar_lea.sflag [#allocation4], %s146_s12  ;;  %s1149_s25 = scalar_lea.hbm %s1328_s27, 128 }
  0x2e   : > { %p1150_p10 = scmp.ne.s32.totalorder %s1328_s27, %s1149_s25  ;;  %p1151_p11 = pneg %p1332_p7 }
  0x2f   : > { %s1154_s30 = scalar_lea.hbm %s1449_s0, 512  ;;  %p1155_p0 = scmp.lt.u32.totalorder %s1328_s27, %s1449_s0 }
  0x30   : > { %p1152_p12 = pnand %p1151_p11, %p1150_p10  ;;  %p1156_p2 = scmp.lt.u32.totalorder %s1154_s30, %s1149_s25 }
  0x31   : > { %p1158_p6 = scmp.lt.u32.totalorder %s1149_s25, %s1328_s27 }
  0x32   : > { %p1153_p13 = pneg %p1152_p12  ;;  %p1157_p3 = por %p1156_p2, %p1155_p0 }
  0x34   : > { %p1159_p8 = por %p1158_p6, %p1157_p3 }
  0x36   : > { %p1160_p9 = pnand %p1159_p8, %p1153_p13 }
  0x38   : > { %1163 = shalt.err (!%p1160_p9)
}
  0x39   : > { %s1164_s6 = scalar_lea.vmem %s1330_s22, 128  ;;  %s1222_s7 = smov [#allocation3]  }
  0x3a   : > { %p1165_p1 = scmp.ne.s32.totalorder %s1330_s22, %s1164_s6  ;;  %s1169_s8 = sshll.u32 %s1222_s7, 4  ;;  %s1170_s8 = int_to_ptr.vmem [resolvable:$false] %s1169_s8 }
  0x3b   : > { %s1171_s9 = scalar_lea.vmem %s1170_s8, 256  ;;  %p1172_p10 = scmp.lt.s32.totalorder %s1330_s22, %s1170_s8 }
  0x3c   : > { %p1167_p4 = pnand %p1165_p1, %p1151_p11  ;;  %p1173_p12 = scmp.lt.s32.totalorder %s1171_s9, %s1164_s6 }
  0x3e   : > { %p1168_p5 = pneg %p1167_p4  ;;  %p1174_p0 = por %p1173_p12, %p1172_p10 }
  0x40   : > { %p1175_p2 = pnand %p1174_p0, %p1168_p5 }
  0x42   : > { %1178 = shalt.err (!%p1175_p2)
}
  0x43   : > { %1071 = dma.hbm_to_vmem [thread:$0]  (!%p1332_p7), %s1328_s27, 128, %s1330_s22, %s147_s17  }
  0x44   : > { %p1460_p13 = scmp.ne.s32.totalorder %s1457_s19, 0 }
  0x45   : > { %s168_s10 = sand.u32 (!%p1460_p13), 1, %s1209_s15   ;;  %p1461_p11 = scmp.ne.s32.totalorder (!%p1460_p13), %s1456_s18, 0 }
  0x46   : > { %166 = sbr.rel (%p1460_p13) target bundleno = 2326 (0x916), region = 32  ;;  %s944_s12 = sshll.u32 (!%p1460_p13), %s168_s10, 3 }
  0x47   : > { %s169_s13 = scalar_lea.sflag (!%p1460_p13), [#allocation4], %s168_s10  ;;  %s172_s14 = scalar_lea.vmem (!%p1460_p13), [#allocation3], %s944_s12 }
  0x4d   : > { %1196 = dma.done.wait (%p1461_p11), %s169_s13, 128  }
  0x4e   : > { %1198 = vsyncadd (%p1461_p11), %s169_s13, 4294967168  ;;  %p1462_p3 = scmp.eq.s32.totalorder %s1270_s2, 0 }
  0x50   : > { %1200 = dma.done.wait (%p1462_p3), [#allocation6], 1664   ;;  %p1463_p6 = pmov %p1462_p3 }
  0x51   : > { %v1223_v0 = vmov 8   ;;  %v1372_v1 = vld [vmem:[%s172_s14] sm:$0xff]  ;;  %v1224_v2 = vmov 0.0   ;;  %vm1225_vm0 = vmmov 0   ;;  %v201_v3 = vld [vmem:[#allocation5] sm:$0xff]  ;;  %v202_v4 = vld [vmem:[#allocation5 + $0x8] sm:$0xff]  ;;  %v219_v7 = vlaneseq }
  0x52   : > { %1202 = vsyncadd (%p1463_p6), [#allocation6], 4294965632  ;;  %1115 = vset.pattern.permute.xlu0 %v1223_v0  ;;  %982 = vmatprep.subr.mxu0 %v1224_v2  ;;  %v1226_v5 = vmov 0.0|0.0   ;;  %v1041_v6 = vpack.c.bf16 %v202_v4, %v201_v3  ;;  %v1385_v10 = vld [vmem:[#allocation5 + $0x60] sm:$0xff]  ;;  %vm228_vm1 = vcmask 64512   ;;  %v203_v14 = vld [vmem:[#allocation5 + $0x10] sm:$0xff] }
  0x53   : > { %216 = vperm.xlu0 %1115, %v1372_v1   ;;  %984 = vmatprep.mubr.msk.f32.mxu0 %vm1225_vm0, %v1224_v2  ;;  %v1382_v8 = vshrl.u32 %v219_v7, 7  ;;  %v204_v15 = vld [vmem:[#allocation5 + $0x18] sm:$0xff]  ;;  %v1227_v17 = vmov 32   ;;  %vm302_vm2 = vcmask 261120   ;;  %v377_v24 = vrot.slane %v1385_v10, 4  ;;  %v205_v44 = vld [vmem:[#allocation5 + $0x20] sm:$0xff] }
  0x54   : > { %995 = vmatprep.mubr.msk.f32.mxu1 %vm1225_vm0, %v1224_v2  ;;  %1040 = vmatprep.subr.bf16.mxu1 %v1226_v5  ;;  %v1044_v16 = vpack.c.bf16 %v204_v15, %v203_v14  ;;  %vm463_vm4 = vcmp.gt.f32.partialorder %v1372_v1, 0.0  ;;  %v206_v45 = vld [vmem:[#allocation5 + $0x28] sm:$0xff]  ;;  %v207_v50 = vld [vmem:[#allocation5 + $0x30] sm:$0xff]  ;;  %v208_v51 = vld [vmem:[#allocation5 + $0x38] sm:$0xff]  ;;  %vm848_vm6 = vcmask 130048   ;;  %vm859_vm7 = vcmask 128005  }
  0x55   : > { %1042 = vmatpush3.bf16.msra.mxu1 %v1041_v6  ;;  %v221_v9 = vsub.s32 0, %v1382_v8  ;;  %v226_v18 = vsub.s32 1, %v1382_v8  ;;  %v1047_v49 = vpack.c.bf16 %v206_v45, %v205_v44  ;;  %v1050_v52 = vpack.c.bf16 %v208_v51, %v207_v50  ;;  %v209_v58 = vld [vmem:[#allocation5 + $0x40] sm:$0xff]  ;;  %v210_v59 = vld [vmem:[#allocation5 + $0x48] sm:$0xff]  ;;  %v211_v0 = vld [vmem:[#allocation5 + $0x50] sm:$0xff]  ;;  %s863_s18 = sld [smem:[#allocation2]] }
  0x56   : > { %1043 = vmatprep.subr.bf16.mxu1 %v1226_v5  ;;  %v622_v55 = vsub.s32 2, %v1382_v8  ;;  %v1053_v63 = vpack.c.bf16 %v210_v59, %v209_v58  ;;  %v212_v3 = vld [vmem:[#allocation5 + $0x58] sm:$0xff]  ;;  %p197_p7 = scmp.lt.s32.totalorder %s1270_s2, 3  ;;  %vm866_vm8 = vcmask 5125  }
  0x57   : > { %v222_v11 = vrot.slane %v1385_v10, %v221_v9  ;;  %1116 = vset.pattern.permute.xlu0 %v1227_v17  ;;  %v227_v19 = vrot.slane %v1385_v10, %v226_v18  ;;  %v1056_v4 = vpack.c.bf16 %v212_v3, %v211_v0 }
  0x58   : > { %v623_v56 = vrot.slane %v1385_v10, %v622_v55  ;;  %s1469_s2 = smov (!%p197_p7, %s1270_s2), 3 }
  0x59   : > { %1045 = vmatpush3.bf16.msra.mxu1 %v1044_v16  ;;  %s199_s26 = scalar_lea.vmem %s1452_s3, %s1469_s2 }
  0x5a   : > { %1024 = vmatprep.subr.mxu1 %v1224_v2 }
  0xd2   : > { %v217_v12 = vpop.permute.xlu0 %216 }
  0xd3   : > { %v223_v13 = vmul.f32 %v222_v11, %v217_v12 }
  0xd5   : > { %983 = vmatpush3.msra.mxu0 %v223_v13 }
  0xd6   : > { %985 = vmatmul.mubr.msk.f32.vlgmr.msra.gmra.mrb[0].mxu0 %vm228_vm1, %v1372_v1  ;;  %998 = vmatprep.subr.mxu0 %v1224_v2 }
  0xd7   : > { %1000 = vmatprep.mubr.msk.f32.mxu0 %vm1225_vm0, %v1224_v2 }
 0x1a9   : > { %v297_v20 = vpop.f32.mrb[0].mxu0 }
 0x1aa   : > { %v298_v21 = vadd.f32 %v297_v20, %v227_v19  ;;  %v986_v22 = vpop.f32.mrb[1].mxu0 }
 0x1ac   : > { %v301_v23 = vmax.f32 %v298_v21, 0.0 }
 0x1ae   : > { %996 = vmatmul.mubr.msk.f32.vlgmr.msra.gmra.mrb[0].mxu1 %vm302_vm2, %v301_v23  ;;  %999 = vmatpush3.xpose.msk.msra.mxu0 %vm302_vm2, %v301_v23  ;;  %v864_v23 = vstv %s863_s18 }
 0x1af   : > { %1003 = vmatprep.subr.mxu0 %v1224_v2  ;;  %1026 = vmatprep.mubr.msk.f32.mxu1 %vm1225_vm0, %v1224_v2 }
 0x1b1   : > { %1001 = vmatmul.mubr.msk.f32.vlgmr.msra.gmra.mrb[2].mxu0 %vm302_vm2, %v377_v24 }
 0x1b2   : > { %1005 = vmatprep.mubr.msk.f32.mxu0 %vm1225_vm0, %v1224_v2 }
 0x281   : > { %v372_v25 = vpop.f32.mrb[0].mxu1 }
 0x282   : > { %452 = vperm.xlu0 %1116, %v372_v25   ;;  %v997_v26 = vpop.f32.mrb[1].mxu1  ;;  %1004 = vmatpush3.msra.mxu0 %v372_v25 }
 0x283   : > { %1008 = vmatprep.subr.mxu0 %v1224_v2 }
 0x284   : > { %v446_v27 = vpop.f32.mrb[2].mxu0 }
 0x285   : > { %v1002_v28 = vpop.f32.mrb[3].mxu0  ;;  %v458_v29 = vrot.slane %v446_v27, %v221_v9  ;;  %v770_v9 = vsub.s32 3, %v1382_v8 }
 0x287   : > { %v771_v11 = vrot.slane %v1385_v10, %v770_v9 }
 0x301   : > { %v453_v30 = vpop.permute.xlu0 %452 }
 0x302   : > { %v459_v31 = vadd.f32 %v458_v29, %v453_v30 }
 0x304   : > { %v461_v32 = vmul.f32 0.2, %v459_v31  ;;  %vm460_vm3 = vcmp.gt.f32.partialorder %v459_v31, 0.0 }
 0x306   : > { %v462_v33 = vsel %vm460_vm3, %v459_v31, %v461_v32 }
 0x307   : > { %v464_v34 = vsel %vm463_vm4, %v462_v33, -9e+15 }
 0x308   : > { %v465_v35 = vsel %vm228_vm1, %v464_v34, -inf }
 0x309   : > { %466 = vmax.xlane.f32.xlu1 %v465_v35 }
 0x396   : > { %v467_v36 = vpop.xlane.xlu1 %466 }
 0x397   : > { %v468_v37 = vsub.f32 %v464_v34, %v467_v36 }
 0x399   : > { %v469_v38 = vmul.f32 1.442695, %v468_v37 }
 0x39b   : > { %1117 = vpow2.f32 %v469_v38 }
 0x3a5   : > { %v1118_v39 = vpop.eup %1117 }
 0x3a6   : > { %v471_v40 = vsel %vm228_vm1, %v1118_v39, 0.0 }
 0x3a7   : > { %472 = vadd.xlane.f32.xlu1 %v471_v40 }
 0x434   : > { %v473_v41 = vpop.xlane.xlu1 %472 }
 0x435   : > { %1119 = vrcp.f32 %v473_v41 }
 0x43f   : > { %v1120_v42 = vpop.eup %1119 }
 0x440   : > { %v475_v43 = vmul.f32 %v1120_v42, %v1118_v39 }
 0x442   : > { %1006 = vmatmul.mubr.msk.f32.vlgmr.msra.gmra.mrb[4].mxu0 %vm228_vm1, %v475_v43 }
 0x443   : > { %1010 = vmatprep.mubr.msk.f32.mxu0 %vm1225_vm0, %v1224_v2 }
 0x515   : > { %v545_v46 = vpop.f32.mrb[4].mxu0 }
 0x516   : > { %v549_v47 = vmax.f32 %v545_v46, 0.0  ;;  %v1007_v48 = vpop.f32.mrb[5].mxu0 }
 0x518   : > { %1009 = vmatpush3.msra.mxu0 %v549_v47 }
 0x519   : > { %1011 = vmatmul.mubr.msk.f32.vlgmr.msra.gmra.mrb[6].mxu0 %vm228_vm1, %v1372_v1  ;;  %1046 = vmatprep.subr.bf16.mxu0 %v1226_v5 }
 0x51a   : > { %1048 = vmatpush3.bf16.msra.mxu0 %v1047_v49  ;;  %1021 = vmatprep.mubr.msk.f32.mxu0 %vm1225_vm0, %v1224_v2 }
 0x51b   : > { %1049 = vmatprep.subr.bf16.mxu0 %v1226_v5 }
 0x51e   : > { %1051 = vmatpush3.bf16.msra.mxu0 %v1050_v52 }
 0x5ec   : > { %v616_v53 = vpop.f32.mrb[6].mxu0 }
 0x5ed   : > { %v1012_v54 = vpop.f32.mrb[7].mxu0  ;;  %1022 = vmatmul.mubr.msk.f32.vlgmr.msra.gmra.mrb[8].mxu0 %vm302_vm2, %v616_v53 }
 0x6c0   : > { %v693_v57 = vpop.f32.mrb[8].mxu0 }
 0x6c1   : > { %v694_v60 = vadd.f32 %v693_v57, %v623_v56  ;;  %v1023_v61 = vpop.f32.mrb[9].mxu0 }
 0x6c3   : > { %v697_v62 = vmax.f32 %v694_v60, 0.0 }
 0x6c5   : > { %1025 = vmatpush3.msra.mxu1 %v697_v62 }
 0x6c6   : > { %1027 = vmatmul.mubr.msk.f32.vlgmr.msra.gmra.mrb[2].mxu1 %vm228_vm1, %v1372_v1  ;;  %1052 = vmatprep.subr.bf16.mxu1 %v1226_v5 }
 0x6c7   : > { %1054 = vmatpush3.bf16.msra.mxu1 %v1053_v63  ;;  %1037 = vmatprep.mubr.msk.f32.mxu1 %vm1225_vm0, %v1224_v2 }
 0x6c8   : > { %1055 = vmatprep.subr.bf16.mxu1 %v1226_v5 }
 0x6cb   : > { %1057 = vmatpush3.bf16.msra.mxu1 %v1056_v4 }
 0x799   : > { %v764_v6 = vpop.f32.mrb[2].mxu1 }
 0x79a   : > { %1038 = vmatmul.mubr.msk.f32.vlgmr.msra.gmra.mrb[4].mxu1 %vm302_vm2, %v764_v6  ;;  %v1028_v7 = vpop.f32.mrb[3].mxu1 }
 0x86d   : > { %v841_v12 = vpop.f32.mrb[4].mxu1 }
 0x86e   : > { %v842_v1 = vadd.f32 %v841_v12, %v771_v11  ;;  %v1039_v13 = vpop.f32.mrb[5].mxu1 }
 0x870   : > { %vm845_vm5 = vcmp.gt.f32.partialorder %v842_v1, 0.0  ;;  %v846_v14 = vmul.f32 0.01, %v842_v1 }
 0x872   : > { %v847_v2 = vsel %vm845_vm5, %v842_v1, %v846_v14 }
 0x873   : > { %v849_v15 = vsel %vm848_vm6, %v847_v2, 0.0 }
 0x874   : > { %v850_v5 = vrot.slane %v849_v15, 4 }
 0x876   : > { %v851_v16 = vadd.f32 %v850_v5, %v849_v15 }
 0x878   : > { %v852_v17 = vrot.slane %v851_v16, 2 }
 0x87a   : > { %v853_v18 = vadd.f32 %v852_v17, %v851_v16 }
 0x87c   : > { %v854_v19 = vrot.slane %v853_v18, 1 }
 0x87e   : > { %v855_v20 = vadd.f32 %v854_v19, %v853_v18 }
 0x880   : > { %v857_v21 = vmul.f32 0.125, %v855_v20 }
 0x882   : > { %v858_v8 = vmul.f32 %v857_v21, %v1385_v10 }
 0x884   : > { %v860_v22 = vsel %vm859_vm7, %v858_v8, 0.0 }
 0x885   : > { %861 = vadd.xlane.f32.xlu1 %v860_v22 }
 0x912   : > { %v862_v24 = vpop.xlane.xlu1 %861 }
 0x913   : > { %v865_v25 = vadd.f32 %v864_v23, %v862_v24 }
 0x915   : > { %867 = vst.msk [vmem:[%s199_s26 - $0x5] sm:$0x20] %vm866_vm8, %v865_v25 }
 0x916 PF: > { %p15_p8 = scmp.ge.s32.totalorder %s1295_s23, 6   ;;  %s1464_s14 = smov %s1209_s15 }
 0x917   : > { %s1465_s15 = smov %s1213_s16  ;;  %s1466_s16 = smov %s1321_s11 }
 0x918   : > { %s1467_s17 = smov %s1295_s23  ;;  %17 = sbr.rel (!%p15_p8) target bundleno = 6 (0x6), region = 76 }
 0x91f   :  { %885 = vsyncpa [#allocation4], 1 }
 0x920   :  { %887 = vsyncpa [#allocation4 + $0x1], 1 }
 0x921   :  { %888 = vsyncpa [#allocation6], 1 }

</bundles_post_ra>
